<compile_context>
chip_gen: v5e
topology: v5e:2x2
jax: 0.10.0
libtpu: 0.0.40
codegen_flags: <defaults>
</compile_context>

<pallas_src>
import functools

import jax
import jax.numpy as jnp
import numpy as np
from jax.experimental import pallas as pl
from jax.experimental.pallas import tpu as pltpu


def _moving_avg_kernel(m_ref, x_ref, o_ref, *, inv_k):
    """out[b] = (M @ x[b]) * (1/k) for one batch element.

    m_ref : (L_out, L)    f32 window-count matrix (integer counts, unscaled)
    x_ref : (1, L, C)     input tile for batch b
    o_ref : (1, L_out, C) output tile for batch b
    """
    acc = jnp.dot(m_ref[...], x_ref[0].astype(jnp.float32),
                  preferred_element_type=jnp.float32)
    o_ref[0] = (acc * inv_k).astype(o_ref.dtype)


def _build_window_counts(seq_len, kernel_size, stride):
    """Fold replicate-padding + AvgPool1d window membership into one matrix.

    counts[i, j] = number of times original row x[:, j, :] appears inside
    pooling window i of the (replicate-)padded sequence.
    """
    pad_front = kernel_size - 1 - (kernel_size - 1) // 2
    pad_end = (kernel_size - 1) // 2
    padded_len = seq_len + pad_front + pad_end        # = seq_len + kernel_size - 1
    out_len = (padded_len - kernel_size) // stride + 1
    counts = np.zeros((out_len, seq_len), dtype=np.float32)
    for i in range(out_len):
        for j in range(kernel_size):
            p = i * stride + j                                   # padded index
            src = min(max(p - pad_front, 0), seq_len - 1)        # replicate clamp
            counts[i, src] += 1.0
    return counts, out_len


def moving_avg(x, kernel_size, stride):
    """Pallas equivalent of moving_avg.forward for x of shape (B, L, C)."""
    B, L, C = x.shape
    counts, L_out = _build_window_counts(L, kernel_size, stride)
    m = jnp.asarray(counts)

    kernel = functools.partial(_moving_avg_kernel, inv_k=1.0 / kernel_size)

    return pl.pallas_call(
        kernel,
        out_shape=jax.ShapeDtypeStruct((B, L_out, C), x.dtype),
        grid_spec=pltpu.PrefetchScalarGridSpec(
            num_scalar_prefetch=0,
            grid=(B,),
            in_specs=[
                pl.BlockSpec((L_out, L), lambda b: (0, 0)),     # M (VMEM-resident)
                pl.BlockSpec((1, L, C), lambda b: (b, 0, 0)),   # x[b]
            ],
            out_specs=pl.BlockSpec((1, L_out, C), lambda b: (b, 0, 0)),
        ),
        compiler_params=pltpu.CompilerParams(
            dimension_semantics=("parallel",)),
    )(m, x)


def moving_avg_ref(x, kernel_size, stride):
    """Pure-JAX reference reproducing the PyTorch module exactly."""
    pad_front = kernel_size - 1 - (kernel_size - 1) // 2
    pad_end = (kernel_size - 1) // 2
    front = jnp.repeat(x[:, :1, :], pad_front, axis=1)
    end = jnp.repeat(x[:, -1:, :], pad_end, axis=1)
    xp = jnp.concatenate([front, x, end], axis=1)
    padded_len = xp.shape[1]
    out_len = (padded_len - kernel_size) // stride + 1
    idx = jnp.arange(out_len)[:, None] * stride + jnp.arange(kernel_size)[None, :]
    windows = xp[:, idx, :]                                      # (B, L_out, k, C)
    return windows.mean(axis=2)


if __name__ == "__main__":
    B, L, C = 2, 16, 32            # batch, seq_len, channels
    KERNEL_SIZE, STRIDE = 5, 1     # typical series-decomposition settings

    x = jax.random.normal(jax.random.PRNGKey(0), (B, L, C), dtype=jnp.float32)

    out = moving_avg(x, KERNEL_SIZE, STRIDE)
    out = jax.block_until_ready(out)

    ref = moving_avg_ref(x, KERNEL_SIZE, STRIDE)

    assert out.shape == ref.shape, (out.shape, ref.shape)
    assert bool(jnp.all(jnp.isfinite(out)))
    max_err = float(jnp.max(jnp.abs(out - ref)))
    assert bool(jnp.allclose(out, ref, rtol=1e-4, atol=1e-4)), max_err
    print("KERNEL_OK")
</pallas_src>

<mosaic_0001>
module attributes {stable_mosaic.version = 11 : i64} {
  func.func @_moving_avg_kernel(%arg0: i32, %arg1: memref<16x16xf32, #tpu.memory_space<vmem>>, %arg2: memref<1x16x32xf32, #tpu.memory_space<vmem>>, %arg3: memref<1x16x32xf32, #tpu.memory_space<vmem>>) attributes {dimension_semantics = [#tpu.dimension_semantics<parallel>], iteration_bounds = array<i64: 2>, scalar_prefetch = 0 : i64, scratch_operands = 0 : i64, tpu.core_type = #tpu.core_type<tc>, window_params = [{pipeline_mode = #tpu.pipeline_mode<synchronous>, transform_indices = @transform_0, window_bounds = array<i64: 16, 16>}, {transform_indices = @transform_1, window_bounds = array<i64: 1, 16, 32>}, {transform_indices = @transform_2, window_bounds = array<i64: 1, 16, 32>}]} {
    %c0 = arith.constant 0 : index
    %c0_0 = arith.constant 0 : index
    %0 = vector.load %arg1[%c0, %c0_0] : memref<16x16xf32, #tpu.memory_space<vmem>>, vector<16x16xf32>
    %c0_1 = arith.constant 0 : index
    %c0_2 = arith.constant 0 : index
    %c0_3 = arith.constant 0 : index
    %1 = vector.load %arg2[%c0_1, %c0_2, %c0_3] : memref<1x16x32xf32, #tpu.memory_space<vmem>>, vector<1x16x32xf32>
    %2 = vector.shape_cast %1 : vector<1x16x32xf32> to vector<16x32xf32>
    %cst = arith.constant dense<0.000000e+00> : vector<16x32xf32>
    %3 = tpu.matmul %0, %2, %cst {dimension_numbers = #tpu.dot_dimension_numbers<[1], [0], [0], [1], [0, 0, 1, 1], [], []>} : vector<16x16xf32>, vector<16x32xf32>, vector<16x32xf32> -> vector<16x32xf32>
    %cst_4 = arith.constant 2.000000e-01 : f32
    %4 = vector.broadcast %cst_4 : f32 to vector<16x32xf32>
    %5 = arith.mulf %3, %4 : vector<16x32xf32>
    %c0_5 = arith.constant 0 : index
    %c0_6 = arith.constant 0 : index
    %c0_7 = arith.constant 0 : index
    %6 = vector.load %arg3[%c0_5, %c0_6, %c0_7] : memref<1x16x32xf32, #tpu.memory_space<vmem>>, vector<1x16x32xf32>
    %7 = vector.shape_cast %6 : vector<1x16x32xf32> to vector<16x32xf32>
    %8 = vector.shape_cast %5 : vector<16x32xf32> to vector<1x16x32xf32>
    tpu.vector_store %arg3[%c0_5, %c0_6, %c0_7], %8 {strides = array<i32>} : memref<1x16x32xf32, #tpu.memory_space<vmem>>, vector<1x16x32xf32>,
    return
  }
  func.func @transform_0(%arg0: i32) -> (i32, i32) {
    %c0_i32 = arith.constant 0 : i32
    %c0_i32_0 = arith.constant 0 : i32
    %c0_i32_1 = arith.constant 0 : i32
    return %c0_i32, %c0_i32_0 : i32, i32
  }
  func.func @transform_1(%arg0: i32) -> (i32, i32, i32) {
    %c0_i32 = arith.constant 0 : i32
    %c0_i32_0 = arith.constant 0 : i32
    %c0_i32_1 = arith.constant 0 : i32
    return %arg0, %c0_i32, %c0_i32_0 : i32, i32, i32
  }
  func.func @transform_2(%arg0: i32) -> (i32, i32, i32) {
    %c0_i32 = arith.constant 0 : i32
    %c0_i32_0 = arith.constant 0 : i32
    %c0_i32_1 = arith.constant 0 : i32
    return %arg0, %c0_i32, %c0_i32_0 : i32, i32, i32
  }
}

</mosaic_0001>

<bundles_post_ra>
// kernel: tpu_custom_call.1
= control target key start
LH: loop header
LB: loop body
LE: loop exit
PB: predicated region body
PF: predicated region fallthrough
CT: control target
= control target key end

     0   :  { %7 = vsyncpa [#allocation3], 0  ;;  %s700_s0 = inlined_call_operand.hbm [shape: f32[16,16], index: 0, kind: input, shape index: {}]   ;;  %s701_s1 = inlined_call_operand.hbm [shape: f32[2,16,32], index: 1, kind: input, shape index: {}]   ;;  %s702_s2 = inlined_call_operand.hbm [shape: f32[2,16,32], index: 2, kind: output, shape index: {}]  }
   0x1   :  { %8 = vsyncpa [#allocation6], 0 }
   0x2   :  { %10 = vsyncpa [#allocation6 + $0x1], 0 }
   0x3   :  { %11 = vsyncpa [#allocation4], 0 }
   0x4   :  { %13 = vsyncpa [#allocation4 + $0x1], 0  ;;  %s556_s9 = smov 0   ;;  %s558_s10 = smov 0  }
   0x5   :  { %s560_s11 = smov 0   ;;  %s562_s12 = smov 0  }
   0x6 LB: > { %s577_s13 = sadd.s32 4294967295, %s534_s12   ;;  %s321_s14 = sadd.s32 4294967294, %s534_s12   ;;  %s534_s12 = sphi %s562_s12, %s712_s12   ;;  %s530_s11 = sphi %s560_s11, %s711_s11   ;;  %s526_s10 = sphi %s558_s10, %s710_s10   ;;  %s522_s9 = sphi %s556_s9, %s709_s9  }
   0x7   : > { %p60_p0 = scmp.ne.s32.totalorder %s526_s10, %s522_s9  ;;  %p61_p1 = scmp.eq.s32.totalorder %s577_s13, 0 }
   0x8   : > { %p84_p2 = scmp.eq.s32.totalorder %s577_s13, 1  ;;  %p90_p3 = scmp.eq.s32.totalorder %s321_s14, 1 }
   0x9   : > { %p586_p4 = por %p61_p1, %p60_p0  ;;  %p322_p5 = scmp.ge.s32.totalorder %s534_s12, 1 }
   0xa   : > { %p591_p6 = por %p90_p3, %p60_p0  ;;  %p97_p7 = scmp.lt.s32.totalorder %s534_s12, 3 }
   0xb   : > { %s108_s19 = sshll.u32 %s700_s0, 4  ;;  %s536_s21 = smov [#allocation2]   ;;  %s109_s19 = int_to_ptr.hbm [resolvable:$true] %s108_s19 }
   0xc   : > { %p599_p8 = pnand %p322_p5, %p97_p7  ;;  %s110_s22 = sshll.u32 %s536_s21, 4  ;;  %s111_s22 = int_to_ptr.vmem [resolvable:$true] %s110_s22 }
   0xd   : > { %s609_s23 = sadd.s32 1, %s534_s12   ;;  %s537_s24 = smov 128  }
   0xe   : > { %p351_p9 = pneg %p599_p8  ;;  %s538_s25 = smov 8  }
   0xf   : > { %s44_s26 = ssub.s32 %s534_s12, %s609_s23  ;;  %s47_s27 = sadd.s32 1, %s530_s11 }
  0x10   : > { %p352_p10 = pnand %p351_p9, %p61_p1  ;;  %p45_p12 = scmp.eq.s32.totalorder %s44_s26, 0 }
  0x11   : > { %p54_p13 = scmp.ne.s32.totalorder %s530_s11, %s526_s10  ;;  %p55_p0 = scmp.eq.s32.totalorder %s534_s12, 0 }
  0x12   : > { %354 = dma.hbm_to_vmem [thread:$0]  (!%p352_p10), %s109_s19, 256, %s111_s22, [#allocation3], %s537_s24, %s537_s24, %s538_s25  }
  0x13   : > { %s621_s28 = scalar_select %p45_p12, %s530_s11, %s47_s27  }
  0x14   : > { %p625_p3 = por %p84_p2, %p54_p13  ;;  %p364_p5 = scmp.lt.s32.totalorder %s534_s12, 2 }
  0x15   : > { %s124_s30 = sand.u32 1, %s530_s11   ;;  %s339_s3 = sshll.u32 %s534_s12, 4 }
  0x16   : > { %p56_p7 = por %p55_p0, %p54_p13  ;;  %s325_s4 = sshll.u32 %s124_s30, 4 }
  0x17   : > { %s133_s7 = scalar_lea.hbm %s701_s1, %s339_s3  ;;  %s128_s14 = scalar_lea.vmem [#allocation5], %s325_s4 }
  0x18   : > { %s134_s8 = sshll.u32 %s133_s7, 4  ;;  %s136_s17 = sshll.u32 %s128_s14, 4  ;;  %s135_s8 = int_to_ptr.hbm [resolvable:$true] %s134_s8  ;;  %s137_s17 = int_to_ptr.vmem [resolvable:$true] %s136_s17 }
  0x19   : > { %p635_p9 = pnand %p364_p5, %p56_p7  ;;  %s125_s19 = scalar_lea.sflag [#allocation6], %s124_s30 }
  0x1a   : > { %s434_s21 = sshra.s32 %s135_s8, 4  ;;  %s441_s3 = scalar_lea.hbm %s701_s1, 32  ;;  %s435_s21 = int_to_ptr.hbm [resolvable:$true] %s434_s21 }
  0x1b   : > { %s436_s22 = scalar_lea.hbm %s435_s21, 16  ;;  %p438_p10 = pneg %p635_p9 }
  0x1c   : > { %p437_p2 = scmp.ne.s32.totalorder %s435_s21, %s436_s22  ;;  %p442_p0 = scmp.lt.s32.totalorder %s435_s21, %s701_s1 }
  0x1d   : > { %p443_p5 = scmp.lt.s32.totalorder %s441_s3, %s436_s22 }
  0x1e   : > { %p439_p12 = pnand %p438_p10, %p437_p2 }
  0x1f   : > { %p444_p7 = por %p443_p5, %p442_p0 }
  0x20   : > { %p440_p13 = pneg %p439_p12 }
  0x22   : > { %p445_p11 = pnand %p444_p7, %p440_p13 }
  0x24   : > { %448 = shalt.err (!%p445_p11)
}
  0x25   : > { %358 = dma.hbm_to_vmem [thread:$0]  (!%p635_p9), %s135_s8, 256, %s137_s17, %s125_s19, %s537_s24, %s537_s24, %s538_s25  }
  0x26   : > { %148 = sbr.rel (%p599_p8) target bundleno = 185 (0xb9), region = 28 }
  0x2b   : > { %509 = dma.done.wait (%p61_p1), [#allocation3], 256  }
  0x2c   : > { %511 = vsyncadd (%p61_p1), [#allocation3], 4294967040  ;;  %s659_s30 = sand.u32 1, %s526_s10  }
  0x2d   : > { %s330_s6 = sshll.u32 %s659_s30, 4  ;;  %s156_s7 = scalar_lea.sflag [#allocation6], %s659_s30 }
  0x2e   : > { %s159_s14 = scalar_lea.vmem [#allocation5], %s330_s6 }
  0x2f   : > { %513 = dma.done.wait (%p586_p4), %s156_s7, 256  }
  0x30   : > { %515 = vsyncadd (%p586_p4), %s156_s7, 4294967040  ;;  %v184_v0 = vld [vmem:[%s159_s14 + $0x8] sm:$0xff]  ;;  %v183_v1 = vld [vmem:[%s159_s14] sm:$0xff]  ;;  %vm185_vm0 = vcmask 130048   ;;  %s340_s20 = sshll.u32 %s577_s13, 4  ;;  %s180_s15 = scalar_lea.vmem [#allocation7], %s330_s6 }
  0x31   : > { %206 = vmatpush.msra.mxu0 %v184_v0  ;;  %341 = vmatpush.msra.mxu1 %v184_v0  ;;  %v181_v2 = vld [vmem:[#allocation2] sm:$0xff]  ;;  %v182_v3 = vld [vmem:[#allocation2 + $0x8] sm:$0xff]  ;;  %s232_s8 = scalar_lea.hbm %s702_s2, %s340_s20  ;;  %s233_s17 = sshll.u32 %s180_s15, 4  ;;  %vm217_vm1 = vcmask 261120   ;;  %s234_s17 = int_to_ptr.vmem [resolvable:$true] %s233_s17 }
  0x32   : > { %s235_s18 = sshll.u32 %s232_s8, 4  ;;  %s221_s19 = scalar_lea.sflag [#allocation4], %s659_s30  ;;  %s236_s18 = int_to_ptr.hbm [resolvable:$true] %s235_s18 }
  0x33   : > { %207 = vmatpush.msra.mxu0 %v183_v1  ;;  %342 = vmatpush.msra.mxu1 %v183_v1  ;;  %s478_s21 = sshra.s32 %s236_s18, 4  ;;  %s484_s27 = scalar_lea.hbm %s702_s2, 32  ;;  %s479_s21 = int_to_ptr.hbm [resolvable:$true] %s478_s21 }
  0x34   : > { %332 = vmatmul.msk.f32.vlgmr.msra.gmra.mxu0 %vm185_vm0, %v181_v2  ;;  %333 = vmatmul.msk.f32.vlgmr.msra.gmra.mxu1 %vm185_vm0, %v182_v3  ;;  %s480_s13 = scalar_lea.hbm %s479_s21, 16  ;;  %p485_p11 = scmp.lt.s32.totalorder %s479_s21, %s702_s2 }
  0x35   : > { %p481_p1 = scmp.ne.s32.totalorder %s479_s21, %s480_s13  ;;  %p486_p9 = scmp.lt.s32.totalorder %s484_s27, %s480_s13 }
  0x37   : > { %p482_p4 = pnand %p481_p1, %p625_p3  ;;  %p487_p2 = por %p486_p9, %p485_p11 }
  0x39   : > { %p483_p8 = pneg %p482_p4 }
  0x3b   : > { %p488_p10 = pnand %p487_p2, %p483_p8 }
  0xb1   : > { %v209_v4 = vpop.f32.mrf.mxu0  ;;  %v212_v5 = vpop.f32.mrf.mxu1 }
  0xb2   : > { %v215_v6 = vmul.f32 0.2, %v209_v4  ;;  %v216_v7 = vmul.f32 0.2, %v212_v5 }
  0xb4   : > { %218 = vst.msk [vmem:[%s180_s15] sm:$0xff] %vm217_vm1, %v215_v6 }
  0xb5   : > { %219 = vst.msk [vmem:[%s180_s15 + $0x8] sm:$0xff] %vm217_vm1, %v216_v7 }
  0xb6   : > { %491 = shalt.err (!%p488_p10)
}
  0xb7   : > { %s539_s5 = smov 128   ;;  %s540_s30 = smov 8  }
  0xb8   : > { %349 = dma.vmem_to_hbm [thread:$0]  (%p625_p3), %s234_s17, 256, %s236_s18, %s221_s19, %s539_s5, %s539_s5, %s540_s30  }
  0xb9 PF: > { %s250_s6 = sand.u32 1, %s522_s9   ;;  %p708_p12 = scmp.ge.s32.totalorder %s534_s12, 2 }
  0xba   : > { %s251_s7 = scalar_lea.sflag [#allocation4], %s250_s6 }
  0xbb   : > { %p360_p13 = pnand %p708_p12, %p591_p6 }
  0xbd   : > { %p361_p0 = pneg %p360_p13 }
  0xbf   : > { %517 = dma.done.wait (%p361_p0), %s251_s7, 256  }
  0xc0   : > { %519 = vsyncadd (%p361_p0), %s251_s7, 4294967040  ;;  %p16_p5 = scmp.ge.s32.totalorder %s609_s23, 4   ;;  %s709_s9 = smov %s526_s10 }
  0xc1   : > { %s710_s10 = smov %s530_s11  ;;  %s711_s11 = smov %s621_s28 }
  0xc2   : > { %s712_s12 = smov %s609_s23  ;;  %18 = sbr.rel (!%p16_p5) target bundleno = 6 (0x6), region = 78 }
  0xc7   :  { %257 = vsyncpa [#allocation3], 1 }
  0xc8   :  { %259 = vsyncpa [#allocation3 + $0x1], 1 }
  0xc9   :  { %260 = vsyncpa [#allocation6], 1 }
  0xca   :  { %262 = vsyncpa [#allocation6 + $0x1], 1 }
  0xcb   :  { %263 = vsyncpa [#allocation4], 1 }
  0xcc   :  { %265 = vsyncpa [#allocation4 + $0x1], 1 }

</bundles_post_ra>
